<compile_context>
chip_gen: v7x
topology: tpu7x:2x2x1
jax: 0.10.0
libtpu: 0.0.40
codegen_flags: <defaults>
</compile_context>

<pallas_src>
import jax
import jax.numpy as jnp
from jax import lax
from jax.experimental import pallas as pl
from jax.experimental.pallas import tpu as pltpu

LANES = 128  # lane-pad width for the output store


def closest_factors(n):
    factor = int(n ** 0.5)
    while n % factor != 0:
        factor -= 1
    return (max(factor, n // factor), min(factor, n // factor))


def make_kernel(B, T1, T2, ts2):
    """Fused conv1+ReLU -> conv2+ReLU -> Linear, whole batch in one invocation."""
    span = ts2 * (T2 - 1) + 1

    def kernel(xc_ref, m1_ref, b1_ref, m2_ref, b2_ref, wl_ref, bl_ref, out_ref):
        # ---- conv1 + ReLU: one matmul over wrapper-side im2col, batch folded in M.
        y1 = jnp.maximum(
            jnp.dot(xc_ref[...], m1_ref[...], preferred_element_type=jnp.float32)
            + b1_ref[...], 0.0)                                    # (B*T1, D*F1) f32

        # ---- conv2 im2col in-registers: per batch element, lane-concatenate the
        # three time-tap row windows of y1 (static slices; no VMEM scratch).
        zs = []
        for b in range(B):
            base = b * T1
            taps = []
            for i in range(3):
                if ts2 == 1:
                    taps.append(y1[base + i: base + i + T2, :])
                else:
                    taps.append(y1[base + i: base + i + span: ts2, :])
            zs.append(jnp.concatenate(taps, axis=1))               # (T2, 3*D*F1)
        z = jnp.concatenate(zs, axis=0).astype(jnp.bfloat16)       # (B*T2, 3*D*F1)

        # ---- conv2 + ReLU: one matmul.
        y2 = jnp.maximum(
            jnp.dot(z, m2_ref[...], preferred_element_type=jnp.float32)
            + b2_ref[...], 0.0)                                    # (B*T2, D*F2) f32

        # ---- Linear (lane-padded to 128 cols): one matmul, full-lane store.
        out_ref[...] = (
            jnp.dot(y2.astype(jnp.bfloat16), wl_ref[...],
                    preferred_element_type=jnp.float32)
            + bl_ref[...])                                         # (B*T2, 128)

    return kernel


def conv2d_subsampling(x, params, cfg):
    """Pallas implementation of Conv2DSubsampling.forward (inference)."""
    cw1, cb1, cw2, cb2, lw, lb = params
    B, T, F = x.shape
    D = cfg["output_dim"]
    ts1, ts2 = cfg["tstrides"]
    fs1, fs2 = cfg["fstrides"]

    # Actual conv output sizes (kernel 3, no padding).
    T1 = (T - 3) // ts1 + 1
    F1 = (F - 3) // fs1 + 1
    T2 = (T1 - 3) // ts2 + 1
    F2 = (F1 - 3) // fs2 + 1

    # The module's own conv_out_dim bookkeeping must match the real conv size.
    c1 = (F - 2) // fs1 + 1
    c2 = (c1 - 2) // fs2 + 1
    assert c1 == F1 and c2 == F2 and lw.shape[1] == D * F2, "inconsistent module config"

    # ------- wrapper-side im2col of x over the time axis (tiny XLA gather) -------
    xw = jnp.stack([x[:, i: i + ts1 * (T1 - 1) + 1: ts1, :] for i in range(3)],
                   axis=2)                                          # (B, T1, 3, F)
    x_cat = xw.reshape(B * T1, 3 * F).astype(jnp.bfloat16)

    # ------- fold conv weights + feature strides into matmul matrices -------
    # conv1: M1[i*F + p, d*F1 + f1] = w1[d, 0, i, j]  where p = fs1*f1 + j.
    j3 = jnp.arange(3)
    sel1 = (jnp.arange(F)[None, :, None] ==
            (fs1 * jnp.arange(F1)[None, None, :] + j3[:, None, None])
            ).astype(jnp.float32)                                   # (3, F, F1)
    M1 = jnp.einsum('jpf,dij->ipdf', sel1, cw1[:, 0]).reshape(3 * F, D * F1)
    M1 = M1.astype(jnp.bfloat16)
    b1 = jnp.repeat(cb1, F1)[None, :]                               # (1, D*F1) f32

    # conv2: M2[i*(D*F1) + din*F1 + q, dout*F2 + f2] = w2[dout, din, i, j],
    # q = fs2*f2 + j.  (Column layout of y1/y2 is channel-major, matching the
    # module's transpose(1,2).view flatten, so the Linear needs no reshuffle.)
    sel2 = (jnp.arange(F1)[None, :, None] ==
            (fs2 * jnp.arange(F2)[None, None, :] + j3[:, None, None])
            ).astype(jnp.float32)                                   # (3, F1, F2)
    M2 = jnp.einsum('jqf,odij->idqof', sel2, cw2).reshape(3 * D * F1, D * F2)
    M2 = M2.astype(jnp.bfloat16)
    b2 = jnp.repeat(cb2, F2)[None, :]                               # (1, D*F2) f32

    # Linear, lane-padded to 128 output columns for an unmasked full-lane store.
    wl_pad = jnp.zeros((D * F2, LANES), jnp.float32).at[:, :D].set(lw.T)
    wl_pad = wl_pad.astype(jnp.bfloat16)
    bl_pad = jnp.zeros((1, LANES), jnp.float32).at[0, :D].set(lb)

    kernel = make_kernel(B, T1, T2, ts2)
    vmem = lambda: pl.BlockSpec(memory_space=pltpu.MemorySpace.VMEM)

    out_flat = pl.pallas_call(
        kernel,
        out_shape=jax.ShapeDtypeStruct((B * T2, LANES), jnp.float32),
        in_specs=[vmem() for _ in range(7)],
        out_specs=vmem(),
    )(x_cat, M1, b1, M2, b2, wl_pad, bl_pad)

    # Strip the lane padding outside the kernel.
    return out_flat.reshape(B, T2, LANES)[:, :, :D]


def reference_forward(x, cw1, cb1, cw2, cb2, lw, lb, tstrides, fstrides):
    """Pure-JAX (f32) replica of the PyTorch forward (for validation)."""
    x4 = x[:, None, :, :]                                           # NCHW
    y = lax.conv_general_dilated(x4, cw1, (tstrides[0], fstrides[0]), "VALID",
                                 dimension_numbers=("NCHW", "OIHW", "NCHW"))
    y = jnp.maximum(y + cb1[None, :, None, None], 0.0)
    y = lax.conv_general_dilated(y, cw2, (tstrides[1], fstrides[1]), "VALID",
                                 dimension_numbers=("NCHW", "OIHW", "NCHW"))
    y = jnp.maximum(y + cb2[None, :, None, None], 0.0)
    b, c, t, f = y.shape
    flat = jnp.transpose(y, (0, 2, 1, 3)).reshape(b, t, c * f)      # channel-major
    return flat @ lw.T + lb[None, None, :]


if __name__ == "__main__":
    B, T = 2, 16
    input_dim, output_dim = 19, 8
    time_stride, feature_stride = 2, 4

    tstrides = closest_factors(time_stride)      # (2, 1)
    fstrides = closest_factors(feature_stride)   # (2, 2)
    D = output_dim
    F1 = (input_dim - 3) // fstrides[0] + 1
    F2 = (F1 - 3) // fstrides[1] + 1
    conv_out_dim = D * F2                        # Linear in_features

    key = jax.random.PRNGKey(0)
    ks = jax.random.split(key, 7)
    x = jax.random.normal(ks[0], (B, T, input_dim), jnp.float32)
    cw1 = 0.2 * jax.random.normal(ks[1], (D, 1, 3, 3), jnp.float32)
    cb1 = 0.1 * jax.random.normal(ks[2], (D,), jnp.float32)
    cw2 = 0.2 * jax.random.normal(ks[3], (D, D, 3, 3), jnp.float32)
    cb2 = 0.1 * jax.random.normal(ks[4], (D,), jnp.float32)
    lw = 0.2 * jax.random.normal(ks[5], (D, conv_out_dim), jnp.float32)
    lb = 0.1 * jax.random.normal(ks[6], (D,), jnp.float32)

    cfg = dict(output_dim=D, tstrides=tstrides, fstrides=fstrides)
    out = conv2d_subsampling(x, (cw1, cb1, cw2, cb2, lw, lb), cfg)
    out = jax.block_until_ready(out)

    ref = reference_forward(x, cw1, cb1, cw2, cb2, lw, lb, tstrides, fstrides)
    assert out.shape == ref.shape, (out.shape, ref.shape)
    # Tolerance reflects bf16 matmul operands (f32 accumulate / epilogue);
    # any indexing/layout bug would produce O(1) errors and still trip this.
    assert jnp.allclose(out, ref, atol=2e-2, rtol=2e-2), float(jnp.max(jnp.abs(out - ref)))
    print("KERNEL_OK")
</pallas_src>

<mosaic_0001>
module attributes {stable_mosaic.version = 11 : i64} {
  func.func @kernel(%arg0: memref<14x57xbf16, #tpu.memory_space<vmem>>, %arg1: memref<57x72xbf16, #tpu.memory_space<vmem>>, %arg2: memref<1x72xf32, #tpu.memory_space<vmem>>, %arg3: memref<216x32xbf16, #tpu.memory_space<vmem>>, %arg4: memref<1x32xf32, #tpu.memory_space<vmem>>, %arg5: memref<32x128xbf16, #tpu.memory_space<vmem>>, %arg6: memref<1x128xf32, #tpu.memory_space<vmem>>, %arg7: memref<10x128xf32, #tpu.memory_space<vmem>>) attributes {dimension_semantics = [], scalar_prefetch = 0 : i64, scratch_operands = 0 : i64, tpu.core_type = #tpu.core_type<tc>} {
    %c0 = arith.constant 0 : index
    %c0_0 = arith.constant 0 : index
    %0 = vector.load %arg0[%c0, %c0_0] : memref<14x57xbf16, #tpu.memory_space<vmem>>, vector<14x57xbf16>
    %c0_1 = arith.constant 0 : index
    %c0_2 = arith.constant 0 : index
    %1 = vector.load %arg1[%c0_1, %c0_2] : memref<57x72xbf16, #tpu.memory_space<vmem>>, vector<57x72xbf16>
    %cst = arith.constant dense<0.000000e+00> : vector<14x72xf32>
    %2 = tpu.matmul %0, %1, %cst {dimension_numbers = #tpu.dot_dimension_numbers<[1], [0], [0], [1], [0, 0, 1, 1], [], []>} : vector<14x57xbf16>, vector<57x72xbf16>, vector<14x72xf32> -> vector<14x72xf32>
    %c0_3 = arith.constant 0 : index
    %c0_4 = arith.constant 0 : index
    %3 = vector.load %arg2[%c0_3, %c0_4] : memref<1x72xf32, #tpu.memory_space<vmem>>, vector<1x72xf32>
    %4 = vector.broadcast %3 : vector<1x72xf32> to vector<14x72xf32>
    %5 = arith.addf %2, %4 : vector<14x72xf32>
    %cst_5 = arith.constant 0.000000e+00 : f32
    %6 = vector.broadcast %cst_5 : f32 to vector<14x72xf32>
    %7 = arith.maximumf %5, %6 : vector<14x72xf32>
    %8 = vector.extract_strided_slice %7 {offsets = [0, 0], sizes = [5, 72], strides = [1, 1]} : vector<14x72xf32> to vector<5x72xf32>
    %9 = vector.extract_strided_slice %7 {offsets = [1, 0], sizes = [5, 72], strides = [1, 1]} : vector<14x72xf32> to vector<5x72xf32>
    %10 = vector.extract_strided_slice %7 {offsets = [2, 0], sizes = [5, 72], strides = [1, 1]} : vector<14x72xf32> to vector<5x72xf32>
    %11 = tpu.concatenate %8, %9, %10 in 1 : vector<5x72xf32>, vector<5x72xf32>, vector<5x72xf32> -> vector<5x216xf32>
    %12 = vector.extract_strided_slice %7 {offsets = [7, 0], sizes = [5, 72], strides = [1, 1]} : vector<14x72xf32> to vector<5x72xf32>
    %13 = vector.extract_strided_slice %7 {offsets = [8, 0], sizes = [5, 72], strides = [1, 1]} : vector<14x72xf32> to vector<5x72xf32>
    %14 = vector.extract_strided_slice %7 {offsets = [9, 0], sizes = [5, 72], strides = [1, 1]} : vector<14x72xf32> to vector<5x72xf32>
    %15 = tpu.concatenate %12, %13, %14 in 1 : vector<5x72xf32>, vector<5x72xf32>, vector<5x72xf32> -> vector<5x216xf32>
    %16 = tpu.concatenate %11, %15 in 0 : vector<5x216xf32>, vector<5x216xf32> -> vector<10x216xf32>
    %17 = arith.truncf %16 : vector<10x216xf32> to vector<10x216xbf16>
    %c0_6 = arith.constant 0 : index
    %c0_7 = arith.constant 0 : index
    %18 = vector.load %arg3[%c0_6, %c0_7] : memref<216x32xbf16, #tpu.memory_space<vmem>>, vector<216x32xbf16>
    %cst_8 = arith.constant dense<0.000000e+00> : vector<10x32xf32>
    %19 = tpu.matmul %17, %18, %cst_8 {dimension_numbers = #tpu.dot_dimension_numbers<[1], [0], [0], [1], [0, 0, 1, 1], [], []>} : vector<10x216xbf16>, vector<216x32xbf16>, vector<10x32xf32> -> vector<10x32xf32>
    %c0_9 = arith.constant 0 : index
    %c0_10 = arith.constant 0 : index
    %20 = vector.load %arg4[%c0_9, %c0_10] : memref<1x32xf32, #tpu.memory_space<vmem>>, vector<1x32xf32>
    %21 = vector.broadcast %20 : vector<1x32xf32> to vector<10x32xf32>
    %22 = arith.addf %19, %21 : vector<10x32xf32>
    %cst_11 = arith.constant 0.000000e+00 : f32
    %23 = vector.broadcast %cst_11 : f32 to vector<10x32xf32>
    %24 = arith.maximumf %22, %23 : vector<10x32xf32>
    %25 = arith.truncf %24 : vector<10x32xf32> to vector<10x32xbf16>
    %c0_12 = arith.constant 0 : index
    %c0_13 = arith.constant 0 : index
    %26 = vector.load %arg5[%c0_12, %c0_13] : memref<32x128xbf16, #tpu.memory_space<vmem>>, vector<32x128xbf16>
    %cst_14 = arith.constant dense<0.000000e+00> : vector<10x128xf32>
    %27 = tpu.matmul %25, %26, %cst_14 {dimension_numbers = #tpu.dot_dimension_numbers<[1], [0], [0], [1], [0, 0, 1, 1], [], []>} : vector<10x32xbf16>, vector<32x128xbf16>, vector<10x128xf32> -> vector<10x128xf32>
    %c0_15 = arith.constant 0 : index
    %c0_16 = arith.constant 0 : index
    %28 = vector.load %arg6[%c0_15, %c0_16] : memref<1x128xf32, #tpu.memory_space<vmem>>, vector<1x128xf32>
    %29 = vector.broadcast %28 : vector<1x128xf32> to vector<10x128xf32>
    %30 = arith.addf %27, %29 : vector<10x128xf32>
    %c0_17 = arith.constant 0 : index
    %c0_18 = arith.constant 0 : index
    %31 = vector.load %arg7[%c0_17, %c0_18] : memref<10x128xf32, #tpu.memory_space<vmem>>, vector<10x128xf32>
    tpu.vector_store %arg7[%c0_17, %c0_18], %30 {strides = array<i32>} : memref<10x128xf32, #tpu.memory_space<vmem>>, vector<10x128xf32>,
    return
  }
}

</mosaic_0001>

<bundles_post_ra>
// kernel: tpu_custom_call.1
= control target key start
LH: loop header
LB: loop body
LE: loop exit
PB: predicated region body
PF: predicated region fallthrough
CT: control target
= control target key end

     0   :  { %v535_v1 = vmov 0.0   ;;  %vm77_vm0 = vcmask 1043456   ;;  %vm78_vm1 = vcmask 1044480   ;;  %v536_v5 = vmov 65535   ;;  %s681_s0 = inlined_call_operand.vmem [shape: bf16[14,57], index: 0, kind: input, shape index: {}]   ;;  %s682_s1 = inlined_call_operand.vmem [shape: bf16[57,72], index: 1, kind: input, shape index: {}]   ;;  %s683_s2 = inlined_call_operand.vmem [shape: f32[1,72], index: 2, kind: input, shape index: {}]   ;;  %s684_s3 = inlined_call_operand.vmem [shape: bf16[216,32], index: 3, kind: input, shape index: {}]   ;;  %s685_s4 = inlined_call_operand.vmem [shape: f32[1,32], index: 4, kind: input, shape index: {}]   ;;  %s686_s5 = inlined_call_operand.vmem [shape: bf16[32,128], index: 5, kind: input, shape index: {}]   ;;  %s687_s6 = inlined_call_operand.vmem [shape: f32[1,128], index: 6, kind: input, shape index: {}]   ;;  %s688_s7 = inlined_call_operand.hbm [shape: f32[10,128], index: 7, kind: output, shape index: {}]  }
   0x1   :  { %v490_v0 = vld [vmem:[%s682_s1] sm:$0xff]   ;;  %456 = vmatprep.subr.bf16.mxu0 %v535_v1  ;;  %v491_v2 = vld [vmem:[%s682_s1 + $0x8] sm:$0xff]   ;;  %v492_v3 = vld [vmem:[%s682_s1 + $0x10] sm:$0xff]   ;;  %v79_v6 = vsel %vm77_vm0, 4294967295, %v536_v5  ;;  %vm537_vm2 = vmmov 0   ;;  %vm73_vm3 = vcmask 465920  }
   0x2   :  { %457 = vmatpush3.bf16.msra.mxu0 %v490_v0  ;;  %v493_v4 = vld [vmem:[%s682_s1 + $0x18] sm:$0x1f]   ;;  %464 = vmatprep.mubr.msk.bf16.mxu0 %vm537_vm2, %v535_v1  ;;  %v80_v7 = vsel %vm78_vm1, %v79_v6, 0  ;;  %v494_v9 = vld [vmem:[%s681_s0] sm:$0x7f]  }
   0x3   :  { %458 = vmatprep.subr.bf16.mxu0 %v535_v1  ;;  %v82_v8 = vand.u32 %v493_v4, %v80_v7 }
   0x6   :  { %459 = vmatpush3.bf16.msra.mxu0 %v491_v2 }
   0x7   :  { %460 = vmatprep.subr.bf16.mxu0 %v535_v1 }
   0xa   :  { %461 = vmatpush3.bf16.msra.mxu0 %v492_v3 }
   0xb   :  { %462 = vmatprep.subr.bf16.mxu0 %v535_v1 }
   0xe   :  { %463 = vmatpush3.bf16.msra.mxu0 %v82_v8 }
   0xf   :  { %468 = vmatprep.subr.bf16.mxu0 %v535_v1 }
  0x10   :  { %12 = vsyncpa [#allocation3], 0  ;;  %v495_v10 = vld [vmem:[%s684_s3] sm:$0xff]   ;;  %v538_v11 = vmov 0   ;;  %v496_v12 = vld [vmem:[%s684_s3 + $0x8] sm:$0xff]   ;;  %s540_s14 = smov 72  }
  0x11   :  { %465 = vmatmul.mubr.msk.bf16.vlgmr.msra.gmra.mrb[0].mxu0 %vm73_vm3, %v494_v9  ;;  %291 = vmatprep.subr.bf16.mxu1 %v538_v11  ;;  %v497_v13 = vld [vmem:[%s684_s3 + $0x10] sm:$0xff]   ;;  %v498_v14 = vld [vmem:[%s684_s3 + $0x18] sm:$0xff]   ;;  %v499_v15 = vld [vmem:[%s684_s3 + $0x20] sm:$0xff]   ;;  %vm136_vm4 = vcmask 588800   ;;  %vm155_vm5 = vcmask 1045504   ;;  %vm138_vm6 = vcmask 130048  }
  0x12   :  { %472 = vmatprep.mubr.msk.bf16.mxu0 %vm537_vm2, %v535_v1  ;;  %292 = vmatpush1.bf16.msra.mxu1 %v495_v10  ;;  %v500_v16 = vld [vmem:[%s684_s3 + $0x28] sm:$0xff]   ;;  %v501_v17 = vld [vmem:[%s684_s3 + $0x30] sm:$0xff]   ;;  %v502_v18 = vld [vmem:[%s684_s3 + $0x38] sm:$0xff]   ;;  %vm284_vm7 = vcmask 719872   ;;  %vm358_vm8 = vcmask 261120  }
  0x13   :  { %293 = vmatprep.subr.bf16.mxu1 %v538_v11  ;;  %v503_v19 = vld [vmem:[%s684_s3 + $0x40] sm:$0xff]   ;;  %v504_v20 = vld [vmem:[%s684_s3 + $0x48] sm:$0xff]   ;;  %v505_v21 = vld [vmem:[%s684_s3 + $0x50] sm:$0xff]  }
  0x14   :  { %v506_v22 = vld [vmem:[%s684_s3 + $0x58] sm:$0xff]   ;;  %v421_v23 = vld [vmem:[%s683_s2] ss:$0 sm:$0xff]  ;;  %v508_v32 = vld [vmem:[%s684_s3 + $0x68] ss:$0 sps:$4 sm:$0xff]   ;;  %s539_s2 = smov 16  }
  0x15   :  { %v507_v25 = vld [vmem:[%s684_s3 + $0x60] sm:$0xff]   ;;  %v289_v35 = vsel %vm77_vm0, %v508_v32, 0  ;;  %v510_v59 = vld [vmem:[%s686_s5 + $0x8] sm:$0xff]  }
  0x16   :  { %294 = vmatpush1.bf16.msra.mxu1 %v496_v12  ;;  %v509_v58 = vld [vmem:[%s686_s5] sm:$0xff]   ;;  %s541_s5 = smov [#allocation2]  }
  0x17   :  { %295 = vmatprep.subr.bf16.mxu1 %v538_v11  ;;  %469 = vmatpush3.bf16.msra.mxu0 %v509_v58  ;;  %v428_v60 = vld [vmem:[%s685_s4] ss:$0 sm:$0xff]  ;;  %s410_s22 = sshll.u32 %s541_s5, 4  ;;  %s411_s22 = int_to_ptr.vmem [resolvable:$true] %s410_s22 }
  0x18   :  { %470 = vmatprep.subr.bf16.mxu0 %v535_v1  ;;  %v444_v1 = vld [vmem:[%s687_s6] ss:$0 sm:$0xff]  ;;  %s511_s4 = scalar_lea.vmem %s411_s22, 256  ;;  %p516_p1 = scmp.lt.s32.totalorder %s411_s22, %s411_s22 }
  0x19   :  { %p512_p0 = scmp.ne.s32.totalorder %s411_s22, %s511_s4  ;;  %p517_p2 = scmp.lt.s32.totalorder %s511_s4, %s511_s4 }
  0x1a   :  { %296 = vmatpush1.bf16.msra.mxu1 %v497_v13 }
  0x1b   :  { %297 = vmatprep.subr.bf16.mxu1 %v538_v11  ;;  %471 = vmatpush3.bf16.msra.mxu0 %v510_v59  ;;  %p518_p3 = por %p517_p2, %p516_p1 }
  0x1d   :  { %p519_p4 = pnand %p518_p3, %p512_p0 }
  0x1e   :  { %298 = vmatpush1.bf16.msra.mxu1 %v498_v14 }
  0x1f   :  { %299 = vmatprep.subr.bf16.mxu1 %v538_v11 }
  0x22   :  { %300 = vmatpush1.bf16.msra.mxu1 %v499_v15 }
  0x23   :  { %301 = vmatprep.subr.bf16.mxu1 %v538_v11 }
  0x26   :  { %302 = vmatpush1.bf16.msra.mxu1 %v500_v16 }
  0x27   :  { %303 = vmatprep.subr.bf16.mxu1 %v538_v11 }
  0x2a   :  { %304 = vmatpush1.bf16.msra.mxu1 %v501_v17 }
  0x2b   :  { %305 = vmatprep.subr.bf16.mxu1 %v538_v11 }
  0x2e   :  { %306 = vmatpush1.bf16.msra.mxu1 %v502_v18 }
  0x2f   :  { %307 = vmatprep.subr.bf16.mxu1 %v538_v11 }
  0x32   :  { %308 = vmatpush1.bf16.msra.mxu1 %v503_v19 }
  0x33   :  { %309 = vmatprep.subr.bf16.mxu1 %v538_v11 }
  0x36   :  { %310 = vmatpush1.bf16.msra.mxu1 %v504_v20 }
  0x37   :  { %311 = vmatprep.subr.bf16.mxu1 %v538_v11 }
  0x3a   :  { %312 = vmatpush1.bf16.msra.mxu1 %v505_v21 }
  0x3b   :  { %313 = vmatprep.subr.bf16.mxu1 %v538_v11 }
  0x3e   :  { %314 = vmatpush1.bf16.msra.mxu1 %v506_v22 }
  0x3f   :  { %315 = vmatprep.subr.bf16.mxu1 %v538_v11 }
  0x42   :  { %316 = vmatpush1.bf16.msra.mxu1 %v507_v25 }
  0x43   :  { %317 = vmatprep.subr.bf16.mxu1 %v538_v11 }
  0x46   :  { %318 = vmatpush1.bf16.msra.mxu1 %v289_v35 }
  0xe4   :  { %v118_v24 = vpop.f32.mrb[0].mxu0 }
  0xe5   :  { %v119_v26 = vadd.f32 %v421_v23, %v118_v24  ;;  %v466_v27 = vpop.f32.mrb[1].mxu0 }
  0xe6   :  { %v121_v28 = vpop.f32.mrb[2].mxu0 }
  0xe7   :  { %v125_v29 = vmax.f32 %v119_v26, 0.0  ;;  %v122_v30 = vadd.f32 %v421_v23, %v121_v28  ;;  %v467_v31 = vpop.f32.mrb[3].mxu0 }
  0xe9   :  { %v126_v33 = vmax.f32 %v122_v30, 0.0  ;;  %v132_v34 = vrot.slane %v125_v29, 2  ;;  %v128_v36 = vrot.slane %v125_v29, 1 }
  0xeb   :  { %133 = vrot.lane.b32.xlu1 %v132_v34, %s539_s2  ;;  %v141_v37 = vrot.slane %v126_v33, 1  ;;  %v145_v39 = vrot.slane %v126_v33, 2 }
  0xed   :  { %v485_v38 = vpack.i.bf16 %v128_v36, %v141_v37 }
  0xef   :  { %486 = vrot.lane.b32.xlu0 %v485_v38, %s540_s14 }
  0xf3   :  { %146 = vrot.lane.b32.xlu0 %v145_v39, %s539_s2 }
 0x15d   :  { %v134_v49 = vpop.permute.xlu1 %133 }
 0x161   :  { %v487_v40 = vpop.permute.xlu0 %486 }
 0x162   :  { %v488_v41 = vunpack.i.l.bf16 %v487_v40  ;;  %v489_v42 = vunpack.i.h.bf16 %v487_v40 }
 0x164   :  { %v149_v43 = vsel %vm136_vm4, %v125_v29, %v488_v41  ;;  %v150_v44 = vsel %vm136_vm4, %v126_v33, %v488_v41  ;;  %v137_v50 = vsel %vm136_vm4, %v125_v29, %v489_v42  ;;  %v139_v53 = vsel %vm138_vm6, %v489_v42, %v134_v49 }
 0x165   :  { %v156_v45 = vrot.slane %v149_v43, 2  ;;  %v147_v46 = vpop.permute.xlu0 %146  ;;  %v157_v47 = vrot.slane %v150_v44, 2 }
 0x166   :  { %v151_v48 = vsel %vm138_vm6, %v488_v41, %v147_v46 }
 0x167   :  { %v159_v51 = vrot.slane %v151_v48, 2  ;;  %v158_v52 = vsel %vm155_vm5, %v156_v45, %v157_v47 }
 0x168   :  { %v165_v54 = vsel %vm78_vm1, %v137_v50, %v158_v52 }
 0x169   :  { %v166_v55 = vsel %vm78_vm1, %v139_v53, %v159_v51  ;;  %v167_v57 = vpack.c.bf16 %v157_v47, %v165_v54 }
 0x16a   :  { %v168_v56 = vpack.c.bf16 %v159_v51, %v166_v55 }
 0x16c   :  { %443 = vmatprep.mubr.msk.bf16.mxu1 %vm284_vm7, %v168_v56 }
 0x16d   :  { %324 = vmatmul.mubr.bf16.vlgmr.msra.gmra.mrb[0].mxu1 %v167_v57 }
 0x240   :  { %v325_v61 = vpop.f32.mrb[0].mxu1 }
 0x241   :  { %v326_v62 = vadd.f32 %v428_v60, %v325_v61  ;;  %v327_v63 = vpop.f32.mrb[1].mxu1 }
 0x242   :  { %v328_v0 = vpop.f32.mrb[2].mxu1 }
 0x243   :  { %v329_v2 = vadd.f32 %v428_v60, %v328_v0  ;;  %v330_v3 = vpop.f32.mrb[3].mxu1  ;;  %v332_v4 = vmax.f32 %v326_v62, 0.0 }
 0x245   :  { %v333_v5 = vmax.f32 %v329_v2, 0.0 }
 0x247   :  { %v334_v6 = vpack.c.bf16 %v333_v5, %v332_v4 }
 0x249   :  { %473 = vmatmul.mubr.msk.bf16.vlgmr.msra.gmra.mrb[4].mxu0 %vm358_vm8, %v334_v6 }
 0x31c   :  { %v396_v7 = vpop.f32.mrb[4].mxu0 }
 0x31d   :  { %v397_v8 = vadd.f32 %v444_v1, %v396_v7  ;;  %v474_v9 = vpop.f32.mrb[5].mxu0 }
 0x31e   :  { %v399_v10 = vpop.f32.mrb[6].mxu0 }
 0x31f   :  { %403 = vst [vmem:[#allocation2] sm:$0xff] %v397_v8  ;;  %v400_v11 = vadd.f32 %v444_v1, %v399_v10  ;;  %v475_v12 = vpop.f32.mrb[7].mxu0 }
 0x321   :  { %404 = vst [vmem:[#allocation2 + $0x8] sm:$0x3] %v400_v11 }
 0x322   :  { %522 = shalt.err (!%p519_p4)
}
 0x323   :  { %s523_s24 = scalar_lea.hbm %s688_s7, 256 }
 0x324   :  { %p524_p5 = scmp.ne.s32.totalorder %s688_s7, %s523_s24  ;;  %p527_p6 = scmp.lt.u32.totalorder %s523_s24, %s688_s7 }
 0x326   :  { %p529_p7 = pnand %p527_p6, %p524_p5 }
 0x328   :  { %532 = shalt.err (!%p529_p7)
}
 0x329   :  { %s542_s29 = smov 128   ;;  %s543_s30 = smov 8  }
 0x32a   :  { %416 = dma.vmem_to_hbm [thread:$0]  %s411_s22, 256, %s688_s7, [#allocation3], %s542_s29, %s542_s29, %s543_s30  }
 0x32b   :  { %533 = dma.done.wait [#allocation3], 256  }
 0x32c   :  { %534 = vsyncadd [#allocation3], 4294967040 }
 0x32d   :  { %420 = vsyncpa [#allocation3], 1 }

</bundles_post_ra>
